<compile_context>
chip_gen: v7x
topology: tpu7x:2x2x1
jax: 0.10.0
libtpu: 0.0.40
codegen_flags: <defaults>
</compile_context>

<pallas_src>
import functools

import jax
import jax.numpy as jnp
from jax import lax
from jax.experimental import pallas as pl
from jax.experimental.pallas import tpu as pltpu


# --------------------------------------------------------------------------------------
# Kernel: one batch tile per grid step.
#   x_ref  : (Bt, C, HW)  or (Bt, HW, C)   activation slab (native dtype)
#   w1_ref : (mid, C)                      fc1 weight, PyTorch (out, in) layout
#   w2_ref : (C, mid)                      fc2 weight, PyTorch (out, in) layout
#   o_ref  : same shape as x_ref
# `spatial_axis` is the axis of x_ref holding H*W (2 for (Bt,C,HW), 1 for (Bt,HW,C)).
# --------------------------------------------------------------------------------------
def _se_kernel(x_ref, w1_ref, w2_ref, o_ref, *, spatial_axis, inv_hw):
    x = x_ref[...]                                                     # native dtype slab

    # squeeze: global average pool, accumulated in f32 (no full-slab f32 copy)
    y = jnp.sum(x, axis=spatial_axis, dtype=jnp.float32) * inv_hw     # (Bt, C) f32

    # excitation MLP: fc1 -> ReLU -> fc2 -> sigmoid (tiny matmuls, f32 accumulate)
    w1 = w1_ref[...].astype(jnp.float32)                              # (mid, C)
    w2 = w2_ref[...].astype(jnp.float32)                              # (C, mid)
    z = lax.dot_general(y, w1, (((1,), (1,)), ((), ())),
                        preferred_element_type=jnp.float32)           # (Bt, mid)
    z = jnp.maximum(z, 0.0)
    g = lax.dot_general(z, w2, (((1,), (1,)), ((), ())),
                        preferred_element_type=jnp.float32)           # (Bt, C)
    g = 1.0 / (1.0 + jnp.exp(-g))                                     # sigmoid (exp on EUP)
    g = g.astype(x.dtype)

    # scale: per-channel gate broadcast over spatial, in the native dtype
    if spatial_axis == 2:                 # (Bt, C, HW): gate broadcasts across lanes
        o_ref[...] = x * g[:, :, None]
    else:                                 # (Bt, HW, C): gate broadcasts across sublanes
        o_ref[...] = x * g[:, None, :]


# --------------------------------------------------------------------------------------
# Batch-tile chooser: big enough to amortize ~0.35 us/step, small enough to
# double-buffer in+out within a conservative VMEM budget, and (when the batch
# allows) keep >= 4 grid steps so v7x megacore sharding + pipelining stay alive.
# --------------------------------------------------------------------------------------
def _choose_batch_tile(B, per_batch_bytes, *, target_step_bytes=1 << 20,
                       vmem_budget_bytes=20 << 20, min_grid_steps=4):
    bt_cap = max(1, vmem_budget_bytes // (4 * per_batch_bytes))
    bt_want = max(1, -(-target_step_bytes // per_batch_bytes))        # ceil div
    bt = max(1, min(B, bt_cap, bt_want))
    if B // bt < min_grid_steps:
        bt = max(1, B // min_grid_steps)
    while B % bt:                                                     # Bt must divide B
        bt -= 1
    return bt


# --------------------------------------------------------------------------------------
# Wrapper: NCHW in, NCHW out (exactly like the PyTorch module's forward).
# --------------------------------------------------------------------------------------
@jax.jit
def se_module_forward(x, w1, w2):
    B, C, H, W = x.shape
    HW = H * W
    mid = w1.shape[0]
    x_bytes = jnp.dtype(x.dtype).itemsize
    w_bytes = 2 * mid * C * jnp.dtype(w1.dtype).itemsize

    # Pick the lane-dense layout: HW on lanes if it is a multiple of 128,
    # otherwise put C on lanes (channels-last view) when C is a multiple of 128.
    channels_last = (HW % 128 != 0) and (C % 128 == 0)
    if channels_last:
        xk = jnp.transpose(x.reshape(B, C, HW), (0, 2, 1))            # (B, HW, C)
        spatial_axis = 1
        blk = lambda bt: (bt, HW, C)
    else:
        xk = x.reshape(B, C, HW)                                      # free reshape
        spatial_axis = 2
        blk = lambda bt: (bt, C, HW)

    bt = _choose_batch_tile(B, C * HW * x_bytes)
    block_bytes = bt * C * HW * x_bytes
    vmem_limit = int(min(max(4 * block_bytes + 4 * w_bytes + (4 << 20), 16 << 20), 56 << 20))

    kernel = functools.partial(_se_kernel, spatial_axis=spatial_axis, inv_hw=1.0 / HW)

    cost = pl.CostEstimate(
        flops=int(2 * B * C * HW + 4 * B * C * mid),
        transcendentals=int(B * C),
        bytes_accessed=int(2 * B * C * HW * x_bytes + w_bytes),
    )

    out = pl.pallas_call(
        kernel,
        out_shape=jax.ShapeDtypeStruct(xk.shape, x.dtype),
        grid=(B // bt,),
        in_specs=[
            pl.BlockSpec(blk(bt), lambda b: (b, 0, 0)),               # activation slab
            pl.BlockSpec((mid, C), lambda b: (0, 0)),                 # fc1 weight (resident)
            pl.BlockSpec((C, mid), lambda b: (0, 0)),                 # fc2 weight (resident)
        ],
        out_specs=pl.BlockSpec(blk(bt), lambda b: (b, 0, 0)),
        compiler_params=pltpu.CompilerParams(
            dimension_semantics=("parallel",),                        # v7x: shard batch tiles
            vmem_limit_bytes=vmem_limit,
        ),
        cost_estimate=cost,
    )(xk, w1, w2)

    if channels_last:
        out = jnp.transpose(out, (0, 2, 1))
    return out.reshape(B, C, H, W)


# --------------------------------------------------------------------------------------
# Pure-JAX reference (mirrors the PyTorch forward) for correctness checks.
# --------------------------------------------------------------------------------------
def se_module_ref(x, w1, w2):
    y = jnp.mean(x, axis=(2, 3))                                      # (B, C)
    z = jnp.maximum(y @ w1.T, 0.0)                                    # (B, mid)
    s = 1.0 / (1.0 + jnp.exp(-(z @ w2.T)))                            # (B, C)
    return x * s[:, :, None, None]


if __name__ == "__main__":
    root = jax.random.PRNGKey(0)

    # (B, C, H, W, reduction, dtype, atol)
    cases = [
        (2, 128, 16, 16, 16, jnp.float32, 1e-5),    # HW=256 -> spatial on lanes
        (4, 128, 7, 7, 16, jnp.float32, 1e-5),      # HW=49  -> channels-last path
        (2, 128, 16, 16, 16, jnp.bfloat16, 5e-2),   # native-dtype scale path
    ]

    for i, (B, C, H, W, red, dtype, atol) in enumerate(cases):
        kx, k1, k2 = jax.random.split(jax.random.fold_in(root, i), 3)
        mid = C // red
        x = jax.random.normal(kx, (B, C, H, W), jnp.float32).astype(dtype)
        # nn.Linear weight layout: (out_features, in_features), bias=False
        w1 = (jax.random.normal(k1, (mid, C), jnp.float32) * (C ** -0.5)).astype(dtype)
        w2 = (jax.random.normal(k2, (C, mid), jnp.float32) * (mid ** -0.5)).astype(dtype)

        out = jax.block_until_ready(se_module_forward(x, w1, w2))
        ref = se_module_ref(x.astype(jnp.float32),
                            w1.astype(jnp.float32), w2.astype(jnp.float32))

        assert out.shape == x.shape, (i, out.shape)
        out_f32 = out.astype(jnp.float32)
        assert bool(jnp.all(jnp.isfinite(out_f32))), i
        err = float(jnp.max(jnp.abs(out_f32 - ref)))
        assert err <= atol, (i, err)

    print("KERNEL_OK")
</pallas_src>

<mosaic_0001>
module attributes {stable_mosaic.version = 11 : i64} {
  func.func @_se_kernel(%arg0: i32, %arg1: memref<1x128x256xf32, #tpu.memory_space<vmem>>, %arg2: memref<8x128xf32, #tpu.memory_space<vmem>>, %arg3: memref<128x8xf32, #tpu.memory_space<vmem>>, %arg4: memref<1x128x256xf32, #tpu.memory_space<vmem>>) attributes {dimension_semantics = [#tpu.dimension_semantics<parallel>], iteration_bounds = array<i64: 2>, scalar_prefetch = 0 : i64, scratch_operands = 0 : i64, tpu.core_type = #tpu.core_type<tc>, window_params = [{transform_indices = @transform_0, window_bounds = array<i64: 1, 128, 256>}, {pipeline_mode = #tpu.pipeline_mode<synchronous>, transform_indices = @transform_1, window_bounds = array<i64: 8, 128>}, {pipeline_mode = #tpu.pipeline_mode<synchronous>, transform_indices = @transform_2, window_bounds = array<i64: 128, 8>}, {transform_indices = @transform_3, window_bounds = array<i64: 1, 128, 256>}]} {
    %c0 = arith.constant 0 : index
    %c0_0 = arith.constant 0 : index
    %c0_1 = arith.constant 0 : index
    %0 = vector.load %arg1[%c0, %c0_0, %c0_1] : memref<1x128x256xf32, #tpu.memory_space<vmem>>, vector<1x128x256xf32>
    %cst = arith.constant dense<0.000000e+00> : vector<1x128xf32>
    %1 = vector.multi_reduction <add>, %0, %cst [2] : vector<1x128x256xf32> to vector<1x128xf32>
    %cst_2 = arith.constant 3.906250e-03 : f32
    %2 = vector.broadcast %cst_2 : f32 to vector<1x128xf32>
    %3 = arith.mulf %1, %2 : vector<1x128xf32>
    %c0_3 = arith.constant 0 : index
    %c0_4 = arith.constant 0 : index
    %4 = vector.load %arg2[%c0_3, %c0_4] : memref<8x128xf32, #tpu.memory_space<vmem>>, vector<8x128xf32>
    %c0_5 = arith.constant 0 : index
    %c0_6 = arith.constant 0 : index
    %5 = vector.load %arg3[%c0_5, %c0_6] : memref<128x8xf32, #tpu.memory_space<vmem>>, vector<128x8xf32>
    %cst_7 = arith.constant dense<0.000000e+00> : vector<1x8xf32>
    %6 = tpu.matmul %3, %4, %cst_7 {dimension_numbers = #tpu.dot_dimension_numbers<[1], [1], [0], [0], [0, 0, 1, 0], [], []>} : vector<1x128xf32>, vector<8x128xf32>, vector<1x8xf32> -> vector<1x8xf32>
    %cst_8 = arith.constant 0.000000e+00 : f32
    %7 = vector.broadcast %cst_8 : f32 to vector<1x8xf32>
    %8 = arith.maximumf %6, %7 : vector<1x8xf32>
    %cst_9 = arith.constant dense<0.000000e+00> : vector<1x128xf32>
    %9 = tpu.matmul %8, %5, %cst_9 {dimension_numbers = #tpu.dot_dimension_numbers<[1], [1], [0], [0], [0, 0, 1, 0], [], []>} : vector<1x8xf32>, vector<128x8xf32>, vector<1x128xf32> -> vector<1x128xf32>
    %cst_10 = arith.constant 0.000000e+00 : f32
    %10 = vector.broadcast %cst_10 : f32 to vector<1x128xf32>
    %11 = arith.subf %10, %9 : vector<1x128xf32>
    %12 = math.exp %11 : vector<1x128xf32>
    %cst_11 = arith.constant 1.000000e+00 : f32
    %13 = vector.broadcast %cst_11 : f32 to vector<1x128xf32>
    %14 = arith.addf %13, %12 : vector<1x128xf32>
    %cst_12 = arith.constant 1.000000e+00 : f32
    %15 = vector.broadcast %cst_12 : f32 to vector<1x128xf32>
    %16 = arith.divf %15, %14 : vector<1x128xf32>
    %17 = vector.shape_cast %16 : vector<1x128xf32> to vector<1x128x1xf32>
    %18 = vector.broadcast %17 : vector<1x128x1xf32> to vector<1x128x256xf32>
    %19 = arith.mulf %0, %18 : vector<1x128x256xf32>
    %c0_13 = arith.constant 0 : index
    %c0_14 = arith.constant 0 : index
    %c0_15 = arith.constant 0 : index
    %20 = vector.load %arg4[%c0_13, %c0_14, %c0_15] : memref<1x128x256xf32, #tpu.memory_space<vmem>>, vector<1x128x256xf32>
    tpu.vector_store %arg4[%c0_13, %c0_14, %c0_15], %19 {strides = array<i32>} : memref<1x128x256xf32, #tpu.memory_space<vmem>>, vector<1x128x256xf32>,
    return
  }
  func.func @transform_0(%arg0: i32) -> (i32, i32, i32) {
    %c0_i32 = arith.constant 0 : i32
    %c0_i32_0 = arith.constant 0 : i32
    %c0_i32_1 = arith.constant 0 : i32
    return %arg0, %c0_i32, %c0_i32_0 : i32, i32, i32
  }
  func.func @transform_1(%arg0: i32) -> (i32, i32) {
    %c0_i32 = arith.constant 0 : i32
    %c0_i32_0 = arith.constant 0 : i32
    %c0_i32_1 = arith.constant 0 : i32
    return %c0_i32, %c0_i32_0 : i32, i32
  }
  func.func @transform_2(%arg0: i32) -> (i32, i32) {
    %c0_i32 = arith.constant 0 : i32
    %c0_i32_0 = arith.constant 0 : i32
    %c0_i32_1 = arith.constant 0 : i32
    return %c0_i32, %c0_i32_0 : i32, i32
  }
  func.func @transform_3(%arg0: i32) -> (i32, i32, i32) {
    %c0_i32 = arith.constant 0 : i32
    %c0_i32_0 = arith.constant 0 : i32
    %c0_i32_1 = arith.constant 0 : i32
    return %arg0, %c0_i32, %c0_i32_0 : i32, i32, i32
  }
}

</mosaic_0001>

<bundles_post_ra>
// kernel: se_module_forward.1
= control target key start
LH: loop header
LB: loop body
LE: loop exit
PB: predicated region body
PF: predicated region fallthrough
CT: control target
= control target key end

     0   :  { %s964_s12 = smov 0   ;;  %s1296_s0 = inlined_call_operand.vmem [shape: f32[2,128,256], index: 0, kind: input, shape index: {}]   ;;  %s1297_s1 = inlined_call_operand.vmem [shape: f32[8,128], index: 1, kind: input, shape index: {}]   ;;  %s1298_s2 = inlined_call_operand.vmem [shape: f32[128,8], index: 2, kind: input, shape index: {}]   ;;  %s1299_s3 = inlined_call_operand.vmem [shape: f32[2,128,256], index: 3, kind: output, shape index: {}]  }
   0x1 LB: > { %s797_s13 = sadd.s32 4294967295, %s939_s12   ;;  %p801_p0 = scmp.ge.s32.totalorder %s939_s12, 1  ;;  %s939_s12 = sphi %s964_s12, %s13_s12  }
   0x2   : > { %p137_p1 = scmp.lt.s32.totalorder %s939_s12, 3 }
   0x4   : > { %p138_p2 = pnand %p801_p0, %p137_p1 }
   0x5   : > { %p161_p3 = scmp.lt.s32.totalorder (!%p138_p2), %s797_s13, 1  ;;  %v941_v48 = vmov (!%p138_p2), 0.0   ;;  %v267_v49 = vld [vmem:[%s1297_s1] sm:$0xff] (!%p138_p2)  ;;  %vm942_vm0 = vmmov (!%p138_p2), 0   ;;  %v269_v51 = vld [vmem:[%s1298_s2 + $0x8] sm:$0xff] (!%p138_p2)  ;;  %vm483_vm1 = vcmask (!%p138_p2), 64512  }
   0x6   : > { %141 = sbr.rel (%p138_p2) target bundleno = 801 (0x321), region = 32  ;;  %846 = vmatprep.subr.mxu0 (!%p138_p2), %v941_v48  ;;  %848 = vmatprep.mubr.msk.f32.mxu0 (!%p138_p2), %vm942_vm0, %v941_v48  ;;  %v268_v50 = vld [vmem:[%s1298_s2] sm:$0xff] (!%p138_p2)  ;;  %v943_v52 = vmov (!%p138_p2), 0.0|0.0   ;;  %vm1121_vm2 = vmpackc.low (!%p138_p2), %vm483_vm1, %vm483_vm1  ;;  %v270_v55 = vld [vmem:[%s1298_s2 + $0x10] sm:$0xff] (!%p138_p2)  ;;  %vm311_vm3 = vcmask (!%p138_p2), 130112   ;;  %vm318_vm4 = vcmask (!%p138_p2), 195712  }
   0x7   : > { %847 = vmatpush3.xpose.msra.mxu0 (!%p138_p2), %v267_v49  ;;  %883 = vmatprep.mubr.msk.f32.mxu1 (!%p138_p2), %vm942_vm0, %v941_v48  ;;  %v887_v53 = vpack.c.bf16 (!%p138_p2), %v269_v51, %v268_v50  ;;  %v271_v56 = vld [vmem:[%s1298_s2 + $0x18] sm:$0xff] (!%p138_p2)  ;;  %v272_v58 = vld [vmem:[%s1298_s2 + $0x20] sm:$0xff] (!%p138_p2)  ;;  %v273_v59 = vld [vmem:[%s1298_s2 + $0x28] sm:$0xff] (!%p138_p2)  ;;  %vm325_vm5 = vcmask (!%p138_p2), 261312   ;;  %vm332_vm6 = vcmask (!%p138_p2), 326912   ;;  %vm339_vm7 = vcmask (!%p138_p2), 392512  }
   0x8   : > { %886 = vmatprep.subr.bf16.mxu1 (!%p138_p2), %v943_v52  ;;  %v891_v57 = vpack.c.bf16 (!%p138_p2), %v271_v56, %v270_v55  ;;  %v895_v60 = vpack.c.bf16 (!%p138_p2), %v273_v59, %v272_v58  ;;  %v274_v61 = vld [vmem:[%s1298_s2 + $0x30] sm:$0xff] (!%p138_p2)  ;;  %v275_v62 = vld [vmem:[%s1298_s2 + $0x38] sm:$0xff] (!%p138_p2)  ;;  %vm346_vm8 = vcmask (!%p138_p2), 458112   ;;  %vm353_vm9 = vcmask (!%p138_p2), 523712  }
   0x9   : > { %889 = vmatpush3.bf16.xpose.msk.msra.mxu1 (!%p138_p2), %vm1121_vm2, %v887_v53  ;;  %v899_v63 = vpack.c.bf16 (!%p138_p2), %v275_v62, %v274_v61  ;;  %vm360_vm10 = vcmask (!%p138_p2), 589312   ;;  %vm367_vm11 = vcmask (!%p138_p2), 654912   ;;  %vm374_vm12 = vcmask (!%p138_p2), 720512  }
   0xa   : > { %890 = vmatprep.subr.bf16.mxu1 (!%p138_p2), %v943_v52  ;;  %vm381_vm13 = vcmask (!%p138_p2), 786112   ;;  %vm388_vm14 = vcmask (!%p138_p2), 851712   ;;  %vm395_vm15 = vcmask (!%p138_p2), 917312   ;;  %vm402_vm0 = vcmask (!%p138_p2), 982912  }
   0xd   : > { %s1303_s13 = smov (!%p161_p3, %s797_s13), 1 }
   0xe   : > { %s825_s14 = sshll.u32 %s1303_s13, 8 }
   0xf   : > { %s980_s17 = scalar_lea.vmem %s1296_s0, %s825_s14  ;;  %s1227_s30 = scalar_lea.vmem %s1299_s3, %s825_s14 }
  0x10   : > { %v983_v0 = vld [vmem:[%s980_s17] sm:$0xff]  ;;  %v986_v1 = vld [vmem:[%s980_s17 + $0x8] sm:$0xff]  ;;  %v997_v5 = vld [vmem:[%s980_s17 + $0x10] sm:$0xff] }
  0x11   : > { %v989_v2 = vld [vmem:[%s980_s17 + $0x20] sm:$0xff]  ;;  %v203_v3 = vadd.f32 %v986_v1, %v983_v0  ;;  %v994_v4 = vld [vmem:[%s980_s17 + $0x28] sm:$0xff]  ;;  %v1000_v6 = vld [vmem:[%s980_s17 + $0x18] sm:$0xff]  ;;  %893 = vmatpush3.bf16.xpose.msk.msra.mxu1 %vm1121_vm2, %v891_v57 }
  0x12   : > { %v209_v7 = vadd.f32 %v994_v4, %v989_v2  ;;  %v1005_v8 = vld [vmem:[%s980_s17 + $0x30] sm:$0xff]  ;;  %v1008_v9 = vld [vmem:[%s980_s17 + $0x38] sm:$0xff]  ;;  %v206_v10 = vadd.f32 %v1000_v6, %v997_v5  ;;  %v1015_v12 = vld [vmem:[%s980_s17 + $0x40] sm:$0xff]  ;;  %894 = vmatprep.subr.bf16.mxu1 %v943_v52 }
  0x13   : > { %204 = vadd.xlane.f32.xlu0 %v203_v3  ;;  %v212_v11 = vadd.f32 %v1008_v9, %v1005_v8  ;;  %v1018_v13 = vld [vmem:[%s980_s17 + $0x48] sm:$0xff]  ;;  %v1021_v14 = vld [vmem:[%s980_s17 + $0x50] sm:$0xff]  ;;  %v1024_v15 = vld [vmem:[%s980_s17 + $0x58] sm:$0xff] }
  0x14   : > { %210 = vadd.xlane.f32.xlu1 %v209_v7  ;;  %v215_v16 = vadd.f32 %v1018_v13, %v1015_v12  ;;  %v218_v17 = vadd.f32 %v1024_v15, %v1021_v14  ;;  %v1031_v18 = vld [vmem:[%s980_s17 + $0x60] sm:$0xff]  ;;  %v1034_v19 = vld [vmem:[%s980_s17 + $0x68] sm:$0xff]  ;;  %v1037_v20 = vld [vmem:[%s980_s17 + $0x70] sm:$0xff] }
  0x15   : > { %v1040_v21 = vld [vmem:[%s980_s17 + $0x78] sm:$0xff]  ;;  %v221_v22 = vadd.f32 %v1034_v19, %v1031_v18  ;;  %v1047_v24 = vld [vmem:[%s980_s17 + $0x80] sm:$0xff]  ;;  %v1050_v25 = vld [vmem:[%s980_s17 + $0x88] sm:$0xff] }
  0x16   : > { %v224_v23 = vadd.f32 %v1040_v21, %v1037_v20  ;;  %v1053_v26 = vld [vmem:[%s980_s17 + $0x90] sm:$0xff]  ;;  %v1056_v27 = vld [vmem:[%s980_s17 + $0x98] sm:$0xff]  ;;  %v227_v28 = vadd.f32 %v1050_v25, %v1047_v24  ;;  %v1063_v30 = vld [vmem:[%s980_s17 + $0xa0] sm:$0xff] }
  0x17   : > { %207 = vadd.xlane.f32.xlu0 %v206_v10  ;;  %v230_v29 = vadd.f32 %v1056_v27, %v1053_v26  ;;  %v1066_v31 = vld [vmem:[%s980_s17 + $0xa8] sm:$0xff]  ;;  %v1069_v32 = vld [vmem:[%s980_s17 + $0xb0] sm:$0xff]  ;;  %v1072_v33 = vld [vmem:[%s980_s17 + $0xb8] sm:$0xff] }
  0x18   : > { %213 = vadd.xlane.f32.xlu1 %v212_v11  ;;  %v233_v34 = vadd.f32 %v1066_v31, %v1063_v30  ;;  %v236_v35 = vadd.f32 %v1072_v33, %v1069_v32  ;;  %v1079_v36 = vld [vmem:[%s980_s17 + $0xc0] sm:$0xff]  ;;  %v1082_v37 = vld [vmem:[%s980_s17 + $0xc8] sm:$0xff]  ;;  %v1085_v38 = vld [vmem:[%s980_s17 + $0xd0] sm:$0xff] }
  0x19   : > { %v1088_v39 = vld [vmem:[%s980_s17 + $0xd8] sm:$0xff]  ;;  %v239_v40 = vadd.f32 %v1082_v37, %v1079_v36  ;;  %v1095_v42 = vld [vmem:[%s980_s17 + $0xe0] sm:$0xff]  ;;  %v1098_v43 = vld [vmem:[%s980_s17 + $0xe8] sm:$0xff]  ;;  %897 = vmatpush3.bf16.xpose.msk.msra.mxu1 %vm1121_vm2, %v895_v60 }
  0x1a   : > { %v242_v41 = vadd.f32 %v1088_v39, %v1085_v38  ;;  %v1101_v44 = vld [vmem:[%s980_s17 + $0xf0] sm:$0xff]  ;;  %v1104_v45 = vld [vmem:[%s980_s17 + $0xf8] sm:$0xff]  ;;  %v245_v46 = vadd.f32 %v1098_v43, %v1095_v42  ;;  %898 = vmatprep.subr.bf16.mxu1 %v943_v52  ;;  %v276_v3 = vld [vmem:[%s1298_s2 + $0x40] sm:$0xff] }
  0x1b   : > { %216 = vadd.xlane.f32.xlu0 %v215_v16  ;;  %v248_v47 = vadd.f32 %v1104_v45, %v1101_v44  ;;  %v277_v7 = vld [vmem:[%s1298_s2 + $0x48] sm:$0xff]  ;;  %v278_v11 = vld [vmem:[%s1298_s2 + $0x50] sm:$0xff]  ;;  %v279_v16 = vld [vmem:[%s1298_s2 + $0x58] sm:$0xff] }
  0x1c   : > { %219 = vadd.xlane.f32.xlu1 %v218_v17  ;;  %v903_v10 = vpack.c.bf16 %v277_v7, %v276_v3  ;;  %v907_v17 = vpack.c.bf16 %v279_v16, %v278_v11 }
  0x1f   : > { %222 = vadd.xlane.f32.xlu0 %v221_v22  ;;  %v280_v22 = vld [vmem:[%s1298_s2 + $0x60] sm:$0xff] }
  0x20   : > { %225 = vadd.xlane.f32.xlu1 %v224_v23  ;;  %v281_v23 = vld [vmem:[%s1298_s2 + $0x68] sm:$0xff] }
  0x21   : > { %901 = vmatpush3.bf16.xpose.msk.msra.mxu1 %vm1121_vm2, %v899_v63 }
  0x22   : > { %902 = vmatprep.subr.bf16.mxu1 %v943_v52 }
  0x23   : > { %228 = vadd.xlane.f32.xlu0 %v227_v28  ;;  %v911_v28 = vpack.c.bf16 %v281_v23, %v280_v22 }
  0x24   : > { %231 = vadd.xlane.f32.xlu1 %v230_v29  ;;  %v282_v29 = vld [vmem:[%s1298_s2 + $0x70] sm:$0xff] }
  0x27   : > { %234 = vadd.xlane.f32.xlu0 %v233_v34  ;;  %v283_v34 = vld [vmem:[%s1298_s2 + $0x78] sm:$0xff] }
  0x28   : > { %237 = vadd.xlane.f32.xlu1 %v236_v35  ;;  %v915_v35 = vpack.c.bf16 %v283_v34, %v282_v29 }
  0x29   : > { %905 = vmatpush3.bf16.xpose.msk.msra.mxu1 %vm1121_vm2, %v903_v10 }
  0x2a   : > { %906 = vmatprep.subr.bf16.mxu1 %v943_v52 }
  0x2b   : > { %240 = vadd.xlane.f32.xlu0 %v239_v40  ;;  %v300_v40 = vlaneseq }
  0x2c   : > { %243 = vadd.xlane.f32.xlu1 %v242_v41 }
  0x2d   : > { %v1183_v41 = vand.u32 127, %v300_v40 }
  0x2f   : > { %246 = vadd.xlane.f32.xlu0 %v245_v46  ;;  %v1185_v46 = vshrl.u32 %v300_v40, 7  ;;  %v313_v49 = vadd.s32 4294967280, %v1183_v41  ;;  %v320_v50 = vadd.s32 4294967272, %v1183_v41  ;;  %v327_v55 = vadd.s32 4294967264, %v1183_v41 }
  0x30   : > { %249 = vadd.xlane.f32.xlu1 %v248_v47  ;;  %v306_v47 = vadd.s32 4294967288, %v1183_v41  ;;  %v334_v60 = vadd.s32 4294967256, %v1183_v41  ;;  %v341_v11 = vadd.s32 4294967248, %v1183_v41 }
  0x31   : > { %909 = vmatpush3.bf16.xpose.msk.msra.mxu1 %vm1121_vm2, %v907_v17  ;;  %v316_v56 = vsub.s32 %v313_v49, %v1185_v46  ;;  %v323_v59 = vsub.s32 %v320_v50, %v1185_v46  ;;  %v330_v10 = vsub.s32 %v327_v55, %v1185_v46  ;;  %v362_v55 = vadd.s32 4294967224, %v1183_v41 }
  0x32   : > { %910 = vmatprep.subr.bf16.mxu1 %v943_v52  ;;  %v309_v54 = vsub.s32 %v306_v47, %v1185_v46  ;;  %v337_v23 = vsub.s32 %v334_v60, %v1185_v46  ;;  %v344_v50 = vsub.s32 %v341_v11, %v1185_v46  ;;  %v376_v11 = vadd.s32 4294967208, %v1183_v41 }
  0x39   : > { %913 = vmatpush3.bf16.xpose.msk.msra.mxu1 %vm1121_vm2, %v911_v28  ;;  %v348_v28 = vadd.s32 4294967240, %v1183_v41 }
  0x3a   : > { %914 = vmatprep.subr.bf16.mxu1 %v943_v52  ;;  %v304_v52 = vsub.s32 %v1183_v41, %v1185_v46 }
  0x41   : > { %917 = vmatpush3.bf16.xpose.msk.msra.mxu1 %vm1121_vm2, %v915_v35  ;;  %vm409_vm2 = vcmask 1048512  }
  0xa0   : > { %v205_v48 = vpop.xlane.xlu0 %204 }
  0xa1   : > { %v211_v51 = vpop.xlane.xlu1 %210  ;;  %v251_v53 = vmul.f32 0.00390625, %v205_v48 }
  0xa2   : > { %v253_v57 = vmul.f32 0.00390625, %v211_v51  ;;  %v355_v51 = vadd.s32 4294967232, %v1183_v41 }
  0xa3   : > { %v305_v3 = vrot.slane %v251_v53, %v304_v52 }
  0xa4   : > { %v208_v58 = vpop.xlane.xlu0 %207  ;;  %v317_v16 = vrot.slane %v253_v57, %v316_v56 }
  0xa5   : > { %v252_v61 = vmul.f32 0.00390625, %v208_v58  ;;  %v214_v62 = vpop.xlane.xlu1 %213 }
  0xa6   : > { %v254_v63 = vmul.f32 0.00390625, %v214_v62  ;;  %v369_v62 = vadd.s32 4294967216, %v1183_v41 }
  0xa7   : > { %v310_v7 = vrot.slane %v252_v61, %v309_v54  ;;  %v351_v54 = vsub.s32 %v348_v28, %v1185_v46  ;;  %v358_v61 = vsub.s32 %v355_v51, %v1185_v46 }
  0xa8   : > { %v324_v17 = vrot.slane %v254_v63, %v323_v59  ;;  %v217_v22 = vpop.xlane.xlu0 %216 }
  0xa9   : > { %v312_v29 = vsel %vm311_vm3, %v310_v7, %v305_v3  ;;  %v255_v34 = vmul.f32 0.00390625, %v217_v22  ;;  %v220_v35 = vpop.xlane.xlu1 %219 }
  0xaa   : > { %v319_v40 = vsel %vm318_vm4, %v317_v16, %v312_v29  ;;  %v256_v47 = vmul.f32 0.00390625, %v220_v35  ;;  %v372_v29 = vsub.s32 %v369_v62, %v1185_v46 }
  0xab   : > { %v326_v48 = vsel %vm325_vm5, %v324_v17, %v319_v40  ;;  %v331_v49 = vrot.slane %v255_v34, %v330_v10  ;;  %v365_v10 = vsub.s32 %v362_v55, %v1185_v46  ;;  %v383_v34 = vadd.s32 4294967200, %v1183_v41 }
  0xac   : > { %v338_v52 = vrot.slane %v256_v47, %v337_v23  ;;  %v223_v53 = vpop.xlane.xlu0 %222 }
  0xad   : > { %v333_v56 = vsel %vm332_vm6, %v331_v49, %v326_v48  ;;  %v257_v57 = vmul.f32 0.00390625, %v223_v53  ;;  %v226_v58 = vpop.xlane.xlu1 %225  ;;  %v379_v48 = vsub.s32 %v376_v11, %v1185_v46  ;;  %v390_v49 = vadd.s32 4294967192, %v1183_v41 }
  0xae   : > { %v258_v59 = vmul.f32 0.00390625, %v226_v58  ;;  %v340_v63 = vsel %vm339_vm7, %v338_v52, %v333_v56  ;;  %v386_v55 = vsub.s32 %v383_v34, %v1185_v46  ;;  %v397_v56 = vadd.s32 4294967184, %v1183_v41 }
  0xaf   : > { %v345_v60 = vrot.slane %v257_v57, %v344_v50 }
  0xb0   : > { %v352_v3 = vrot.slane %v258_v59, %v351_v54  ;;  %v229_v7 = vpop.xlane.xlu0 %228  ;;  %v400_v11 = vsub.s32 %v397_v56, %v1185_v46 }
  0xb1   : > { %v347_v16 = vsel %vm346_vm8, %v345_v60, %v340_v63  ;;  %v259_v17 = vmul.f32 0.00390625, %v229_v7  ;;  %v232_v22 = vpop.xlane.xlu1 %231  ;;  %v393_v60 = vsub.s32 %v390_v49, %v1185_v46 }
  0xb2   : > { %v260_v23 = vmul.f32 0.00390625, %v232_v22  ;;  %v354_v35 = vsel %vm353_vm9, %v352_v3, %v347_v16 }
  0xb3   : > { %v359_v28 = vrot.slane %v259_v17, %v358_v61  ;;  %v404_v61 = vadd.s32 4294967176, %v1183_v41 }
  0xb4   : > { %v366_v40 = vrot.slane %v260_v23, %v365_v10  ;;  %v235_v47 = vpop.xlane.xlu0 %234 }
  0xb5   : > { %v361_v50 = vsel %vm360_vm10, %v359_v28, %v354_v35  ;;  %v261_v51 = vmul.f32 0.00390625, %v235_v47  ;;  %v238_v52 = vpop.xlane.xlu1 %237  ;;  %v407_v23 = vsub.s32 %v404_v61, %v1185_v46 }
  0xb6   : > { %v262_v53 = vmul.f32 0.00390625, %v238_v52  ;;  %v368_v57 = vsel %vm367_vm11, %v366_v40, %v361_v50 }
  0xb7   : > { %v373_v54 = vrot.slane %v261_v51, %v372_v29 }
  0xb8   : > { %v380_v58 = vrot.slane %v262_v53, %v379_v48  ;;  %v241_v59 = vpop.xlane.xlu0 %240 }
  0xb9   : > { %v375_v62 = vsel %vm374_vm12, %v373_v54, %v368_v57  ;;  %v263_v63 = vmul.f32 0.00390625, %v241_v59  ;;  %v244_v3 = vpop.xlane.xlu1 %243  ;;  %v613_v59 = vsub.s32 0, %v1185_v46 }
  0xba   : > { %v264_v7 = vmul.f32 0.00390625, %v244_v3  ;;  %v382_v16 = vsel %vm381_vm13, %v380_v58, %v375_v62 }
  0xbb   : > { %v387_v10 = vrot.slane %v263_v63, %v386_v55 }
  0xbc   : > { %v394_v17 = vrot.slane %v264_v7, %v393_v60  ;;  %v247_v22 = vpop.xlane.xlu0 %246 }
  0xbd   : > { %v389_v28 = vsel %vm388_vm14, %v387_v10, %v382_v16  ;;  %v265_v29 = vmul.f32 0.00390625, %v247_v22  ;;  %v250_v34 = vpop.xlane.xlu1 %249 }
  0xbe   : > { %v266_v35 = vmul.f32 0.00390625, %v250_v34  ;;  %v396_v47 = vsel %vm395_vm15, %v394_v17, %v389_v28 }
  0xbf   : > { %v401_v41 = vrot.slane %v265_v29, %v400_v11 }
  0xc0   : > { %v408_v40 = vrot.slane %v266_v35, %v407_v23 }
  0xc1   : > { %v403_v48 = vsel %vm402_vm0, %v401_v41, %v396_v47 }
  0xc2   : > { %v410_v49 = vsel %vm409_vm2, %v408_v40, %v403_v48 }
  0xc3   : > { %849 = vmatmul.mubr.f32.vlgmr.msra.gmra.mrb[0].mxu0 %v410_v49 }
 0x196   : > { %v478_v50 = vpop.f32.mrb[0].mxu0 }
 0x197   : > { %v482_v51 = vmax.f32 %v478_v50, 0.0  ;;  %v850_v52 = vpop.f32.mrb[1].mxu0 }
 0x199   : > { %884 = vmatmul.mubr.msk.f32.vlgmr.msra.gmra.mrb[0].mxu1 %vm483_vm1, %v482_v51 }
 0x26c   : > { %v601_v53 = vpop.f32.mrb[0].mxu1 }
 0x26d   : > { %v605_v54 = vsub.f32 0.0, %v601_v53  ;;  %v885_v55 = vpop.f32.mrb[1].mxu1 }
 0x26f   : > { %v606_v56 = vmul.f32 1.442695, %v605_v54 }
 0x271   : > { %929 = vpow2.f32 %v606_v56 }
 0x27b   : > { %v930_v57 = vpop.eup %929 }
 0x27c   : > { %v608_v58 = vadd.f32 1.0, %v930_v57 }
 0x27e   : > { %931 = vrcp.f32 %v608_v58 }
 0x288   : > { %v932_v60 = vpop.eup %931 }
 0x289   : > { %v614_v61 = vrot.slane %v932_v60, %v613_v59 }
 0x28b   : > { %620 = vbcast.lane.b32.xlu1 %v614_v61, 264  ;;  %616 = vbcast.lane.b32.xlu0 %v614_v61, 256 }
 0x28f   : > { %624 = vbcast.lane.b32.xlu1 %v614_v61, 272  ;;  %632 = vbcast.lane.b32.xlu0 %v614_v61, 288 }
 0x293   : > { %628 = vbcast.lane.b32.xlu1 %v614_v61, 280  ;;  %640 = vbcast.lane.b32.xlu0 %v614_v61, 304 }
 0x297   : > { %636 = vbcast.lane.b32.xlu1 %v614_v61, 296  ;;  %648 = vbcast.lane.b32.xlu0 %v614_v61, 320 }
 0x29b   : > { %644 = vbcast.lane.b32.xlu1 %v614_v61, 312  ;;  %656 = vbcast.lane.b32.xlu0 %v614_v61, 336 }
 0x29f   : > { %652 = vbcast.lane.b32.xlu1 %v614_v61, 328  ;;  %664 = vbcast.lane.b32.xlu0 %v614_v61, 352 }
 0x2a3   : > { %660 = vbcast.lane.b32.xlu1 %v614_v61, 344  ;;  %672 = vbcast.lane.b32.xlu0 %v614_v61, 368 }
 0x2a7   : > { %668 = vbcast.lane.b32.xlu1 %v614_v61, 360 }
 0x2ab   : > { %676 = vbcast.lane.b32.xlu1 %v614_v61, 376 }
 0x2fd   : > { %v621_v46 = vpop.permute.xlu1 %620  ;;  %v617_v62 = vpop.permute.xlu0 %616 }
 0x2fe   : > { %v680_v63 = vmul.f32 %v621_v46, %v997_v5  ;;  %v681_v3 = vmul.f32 %v621_v46, %v1000_v6  ;;  %v678_v7 = vmul.f32 %v617_v62, %v983_v0  ;;  %v679_v10 = vmul.f32 %v617_v62, %v986_v1 }
 0x300   : > { %712 = vst [vmem:[%s1227_s30 + $0x10] sm:$0xff] %v680_v63  ;;  %713 = vst [vmem:[%s1227_s30 + $0x18] sm:$0xff] %v681_v3 }
 0x301   : > { %710 = vst [vmem:[%s1227_s30] sm:$0xff] %v678_v7  ;;  %711 = vst [vmem:[%s1227_s30 + $0x8] sm:$0xff] %v679_v10  ;;  %v625_v11 = vpop.permute.xlu1 %624  ;;  %v633_v16 = vpop.permute.xlu0 %632 }
 0x302   : > { %v682_v17 = vmul.f32 %v625_v11, %v989_v2  ;;  %v683_v5 = vmul.f32 %v625_v11, %v994_v4  ;;  %v686_v6 = vmul.f32 %v633_v16, %v1015_v12  ;;  %v687_v0 = vmul.f32 %v633_v16, %v1018_v13 }
 0x304   : > { %714 = vst [vmem:[%s1227_s30 + $0x20] sm:$0xff] %v682_v17  ;;  %715 = vst [vmem:[%s1227_s30 + $0x28] sm:$0xff] %v683_v5 }
 0x305   : > { %718 = vst [vmem:[%s1227_s30 + $0x40] sm:$0xff] %v686_v6  ;;  %719 = vst [vmem:[%s1227_s30 + $0x48] sm:$0xff] %v687_v0  ;;  %v629_v1 = vpop.permute.xlu1 %628  ;;  %v641_v22 = vpop.permute.xlu0 %640 }
 0x306   : > { %v684_v23 = vmul.f32 %v629_v1, %v1005_v8  ;;  %v685_v2 = vmul.f32 %v629_v1, %v1008_v9  ;;  %v690_v4 = vmul.f32 %v641_v22, %v1031_v18  ;;  %v691_v12 = vmul.f32 %v641_v22, %v1034_v19 }
 0x308   : > { %716 = vst [vmem:[%s1227_s30 + $0x30] sm:$0xff] %v684_v23  ;;  %717 = vst [vmem:[%s1227_s30 + $0x38] sm:$0xff] %v685_v2 }
 0x309   : > { %722 = vst [vmem:[%s1227_s30 + $0x60] sm:$0xff] %v690_v4  ;;  %723 = vst [vmem:[%s1227_s30 + $0x68] sm:$0xff] %v691_v12  ;;  %v637_v13 = vpop.permute.xlu1 %636  ;;  %v649_v28 = vpop.permute.xlu0 %648 }
 0x30a   : > { %v688_v29 = vmul.f32 %v637_v13, %v1021_v14  ;;  %v689_v8 = vmul.f32 %v637_v13, %v1024_v15  ;;  %v694_v9 = vmul.f32 %v649_v28, %v1047_v24  ;;  %v695_v18 = vmul.f32 %v649_v28, %v1050_v25 }
 0x30c   : > { %720 = vst [vmem:[%s1227_s30 + $0x50] sm:$0xff] %v688_v29  ;;  %721 = vst [vmem:[%s1227_s30 + $0x58] sm:$0xff] %v689_v8 }
 0x30d   : > { %726 = vst [vmem:[%s1227_s30 + $0x80] sm:$0xff] %v694_v9  ;;  %727 = vst [vmem:[%s1227_s30 + $0x88] sm:$0xff] %v695_v18  ;;  %v645_v19 = vpop.permute.xlu1 %644  ;;  %v657_v34 = vpop.permute.xlu0 %656 }
 0x30e   : > { %v692_v35 = vmul.f32 %v645_v19, %v1037_v20  ;;  %v693_v14 = vmul.f32 %v645_v19, %v1040_v21  ;;  %v698_v15 = vmul.f32 %v657_v34, %v1063_v30  ;;  %v699_v24 = vmul.f32 %v657_v34, %v1066_v31 }
 0x310   : > { %724 = vst [vmem:[%s1227_s30 + $0x70] sm:$0xff] %v692_v35  ;;  %725 = vst [vmem:[%s1227_s30 + $0x78] sm:$0xff] %v693_v14 }
 0x311   : > { %730 = vst [vmem:[%s1227_s30 + $0xa0] sm:$0xff] %v698_v15  ;;  %731 = vst [vmem:[%s1227_s30 + $0xa8] sm:$0xff] %v699_v24  ;;  %v653_v25 = vpop.permute.xlu1 %652  ;;  %v665_v41 = vpop.permute.xlu0 %664 }
 0x312   : > { %v696_v40 = vmul.f32 %v653_v25, %v1053_v26  ;;  %v697_v20 = vmul.f32 %v653_v25, %v1056_v27  ;;  %v702_v21 = vmul.f32 %v665_v41, %v1079_v36  ;;  %v703_v30 = vmul.f32 %v665_v41, %v1082_v37 }
 0x314   : > { %728 = vst [vmem:[%s1227_s30 + $0x90] sm:$0xff] %v696_v40  ;;  %729 = vst [vmem:[%s1227_s30 + $0x98] sm:$0xff] %v697_v20 }
 0x315   : > { %734 = vst [vmem:[%s1227_s30 + $0xc0] sm:$0xff] %v702_v21  ;;  %735 = vst [vmem:[%s1227_s30 + $0xc8] sm:$0xff] %v703_v30  ;;  %v661_v31 = vpop.permute.xlu1 %660  ;;  %v673_v47 = vpop.permute.xlu0 %672 }
 0x316   : > { %v700_v48 = vmul.f32 %v661_v31, %v1069_v32  ;;  %v701_v26 = vmul.f32 %v661_v31, %v1072_v33  ;;  %v706_v27 = vmul.f32 %v673_v47, %v1095_v42  ;;  %v707_v36 = vmul.f32 %v673_v47, %v1098_v43 }
 0x318   : > { %732 = vst [vmem:[%s1227_s30 + $0xb0] sm:$0xff] %v700_v48  ;;  %733 = vst [vmem:[%s1227_s30 + $0xb8] sm:$0xff] %v701_v26 }
 0x319   : > { %738 = vst [vmem:[%s1227_s30 + $0xe0] sm:$0xff] %v706_v27  ;;  %739 = vst [vmem:[%s1227_s30 + $0xe8] sm:$0xff] %v707_v36  ;;  %v669_v37 = vpop.permute.xlu1 %668 }
 0x31a   : > { %v704_v49 = vmul.f32 %v669_v37, %v1085_v38  ;;  %v705_v50 = vmul.f32 %v669_v37, %v1088_v39 }
 0x31c   : > { %736 = vst [vmem:[%s1227_s30 + $0xd0] sm:$0xff] %v704_v49  ;;  %737 = vst [vmem:[%s1227_s30 + $0xd8] sm:$0xff] %v705_v50 }
 0x31d   : > { %v677_v32 = vpop.permute.xlu1 %676 }
 0x31e   : > { %v708_v51 = vmul.f32 %v677_v32, %v1101_v44  ;;  %v709_v33 = vmul.f32 %v677_v32, %v1104_v45 }
 0x320   : > { %740 = vst [vmem:[%s1227_s30 + $0xf0] sm:$0xff] %v708_v51  ;;  %741 = vst [vmem:[%s1227_s30 + $0xf8] sm:$0xff] %v709_v33 }
 0x321 PF: > { %s13_s12 = sadd.s32 1, %s939_s12  }
 0x322   : > { %p10_p4 = scmp.ge.s32.totalorder %s13_s12, 4  }
 0x324   :  { %12 = sbr.rel (!%p10_p4) target bundleno = 1 (0x1), region = 62 }

</bundles_post_ra>
